<compile_context>
chip_gen: v7x
topology: tpu7x:2x2x1
jax: 0.10.0
libtpu: 0.0.40
codegen_flags: <defaults>
</compile_context>

<pallas_src>
import jax
import jax.numpy as jnp
from jax.experimental import pallas as pl
from jax.experimental.pallas import tpu as pltpu


def _gpm_kernel(x_ref, w1_ref, c1_ref, w2_ref, c2_ref, o_ref):
    # x_ref : (1, C, tn)  io_dtype      (one batch element, tn tokens, channels on sublanes)
    # w*_ref: (C, C)      io_dtype      (BN-folded 1x1-conv weights)
    # c*_ref: (C, 1)      f32           (BN-folded biases)
    x = x_ref[0]                                                   # (C, tn)

    # conv1 (1x1) + folded BN1  -> f32 accumulation on the MXU
    h = jnp.dot(w1_ref[...], x, preferred_element_type=jnp.float32) + c1_ref[...]
    # exact (erf-based) GELU, matching PyTorch nn.GELU default, in f32
    h = 0.5 * h * (1.0 + jax.lax.erf(h * 0.7071067811865476))

    # conv2 (1x1) + folded BN2
    h = h.astype(w2_ref.dtype)
    y = jnp.dot(w2_ref[...], h, preferred_element_type=jnp.float32) + c2_ref[...]

    # dropout (eval) == identity; residual add in f32
    o_ref[0] = (y + x.astype(jnp.float32)).astype(o_ref.dtype)


def _pick_tn(N, tn):
    """Pick a token tile: multiple of 128 that divides N, as large as reasonable."""
    if tn is not None and N % tn == 0:
        return tn
    for cand in (1024, 512, 256, 128):
        if cand <= N and N % cand == 0:
            return cand
    return N  # full extent (allowed even if not a multiple of 128)


def graph_processing_forward(x, params, *, tn=None, io_dtype=None):
    """x: (B, C, N); returns (B, C, N) in io_dtype (defaults to x.dtype)."""
    B, C, N = x.shape
    io_dtype = io_dtype if io_dtype is not None else x.dtype
    tn = _pick_tn(N, tn)

    eps = 1e-5
    s1 = params["bn1_gamma"] / jnp.sqrt(params["bn1_var"] + eps)          # (C,)
    s2 = params["bn2_gamma"] / jnp.sqrt(params["bn2_var"] + eps)

    # Fold:  BN(W x + b) = (s[:,None] * W) x + (s * (b - mean) + beta)
    w1_eff = (params["w1"] * s1[:, None]).astype(io_dtype)                # (C, C)
    c1 = (s1 * (params["b1"] - params["bn1_mean"]) + params["bn1_beta"]
          ).reshape(C, 1).astype(jnp.float32)
    w2_eff = (params["w2"] * s2[:, None]).astype(io_dtype)
    c2 = (s2 * (params["b2"] - params["bn2_mean"]) + params["bn2_beta"]
          ).reshape(C, 1).astype(jnp.float32)

    x_io = x.astype(io_dtype)

    grid = (B, N // tn)
    out = pl.pallas_call(
        _gpm_kernel,
        out_shape=jax.ShapeDtypeStruct((B, C, N), io_dtype),
        grid_spec=pltpu.PrefetchScalarGridSpec(
            num_scalar_prefetch=0,
            grid=grid,
            in_specs=[
                pl.BlockSpec((1, C, tn), lambda b, i: (b, 0, i)),   # x tile
                pl.BlockSpec((C, C), lambda b, i: (0, 0)),          # W1_eff
                pl.BlockSpec((C, 1), lambda b, i: (0, 0)),          # c1
                pl.BlockSpec((C, C), lambda b, i: (0, 0)),          # W2_eff
                pl.BlockSpec((C, 1), lambda b, i: (0, 0)),          # c2
            ],
            out_specs=pl.BlockSpec((1, C, tn), lambda b, i: (b, 0, i)),
        ),
        compiler_params=pltpu.CompilerParams(
            dimension_semantics=("parallel", "parallel"),
            vmem_limit_bytes=32 * 1024 * 1024),
    )(x_io, w1_eff, c1, w2_eff, c2)
    return out


def init_params(key, dim):
    ks = jax.random.split(key, 4)
    scale = 1.0 / jnp.sqrt(jnp.float32(dim))  # PyTorch Conv1d default init range
    return {
        "w1": jax.random.uniform(ks[0], (dim, dim), jnp.float32, -scale, scale),
        "b1": jax.random.uniform(ks[1], (dim,), jnp.float32, -scale, scale),
        "w2": jax.random.uniform(ks[2], (dim, dim), jnp.float32, -scale, scale),
        "b2": jax.random.uniform(ks[3], (dim,), jnp.float32, -scale, scale),
        # BatchNorm1d defaults: gamma=1, beta=0, running_mean=0, running_var=1
        "bn1_gamma": jnp.ones((dim,), jnp.float32),
        "bn1_beta": jnp.zeros((dim,), jnp.float32),
        "bn1_mean": jnp.zeros((dim,), jnp.float32),
        "bn1_var": jnp.ones((dim,), jnp.float32),
        "bn2_gamma": jnp.ones((dim,), jnp.float32),
        "bn2_beta": jnp.zeros((dim,), jnp.float32),
        "bn2_mean": jnp.zeros((dim,), jnp.float32),
        "bn2_var": jnp.ones((dim,), jnp.float32),
    }


def _reference(x, params):
    # Pure-JAX reference (eval-mode semantics), f32.
    eps = 1e-5
    h = jnp.einsum("oi,bin->bon", params["w1"], x) + params["b1"][None, :, None]
    s1 = params["bn1_gamma"] / jnp.sqrt(params["bn1_var"] + eps)
    h = h * s1[None, :, None] + (params["bn1_beta"] - params["bn1_mean"] * s1)[None, :, None]
    h = 0.5 * h * (1.0 + jax.lax.erf(h / jnp.sqrt(2.0)))
    y = jnp.einsum("oi,bin->bon", params["w2"], h) + params["b2"][None, :, None]
    s2 = params["bn2_gamma"] / jnp.sqrt(params["bn2_var"] + eps)
    y = y * s2[None, :, None] + (params["bn2_beta"] - params["bn2_mean"] * s2)[None, :, None]
    return y + x


if __name__ == "__main__":
    key = jax.random.PRNGKey(0)
    k_x, k_p = jax.random.split(key)

    B, C, N = 2, 32, 1024            # input_dim == output_dim == 32, N graph nodes
    x = jax.random.normal(k_x, (B, C, N), jnp.float32)
    params = init_params(k_p, C)

    ref = _reference(x, params)

    # f32 I/O path: tight check against the pure-JAX reference.
    out_f32 = jax.block_until_ready(graph_processing_forward(x, params))
    assert out_f32.shape == (B, C, N)
    assert jnp.allclose(out_f32, ref, atol=1e-4, rtol=1e-4), "f32 kernel mismatch vs reference"

    # bf16 I/O path (bandwidth-optimized): looser check.
    out_bf16 = jax.block_until_ready(
        graph_processing_forward(x, params, io_dtype=jnp.bfloat16))
    assert out_bf16.shape == (B, C, N)
    assert jnp.allclose(out_bf16.astype(jnp.float32), ref, atol=7e-2, rtol=7e-2), \
        "bf16 kernel mismatch vs reference"

    print("KERNEL_OK")
</pallas_src>

<mosaic_0001>
module attributes {stable_mosaic.version = 11 : i64} {
  func.func @_gpm_kernel(%arg0: i32, %arg1: i32, %arg2: memref<1x32x1024xf32, #tpu.memory_space<vmem>>, %arg3: memref<32x32xf32, #tpu.memory_space<vmem>>, %arg4: memref<32x1xf32, #tpu.memory_space<vmem>>, %arg5: memref<32x32xf32, #tpu.memory_space<vmem>>, %arg6: memref<32x1xf32, #tpu.memory_space<vmem>>, %arg7: memref<1x32x1024xf32, #tpu.memory_space<vmem>>) attributes {dimension_semantics = [#tpu.dimension_semantics<parallel>, #tpu.dimension_semantics<parallel>], iteration_bounds = array<i64: 2, 1>, scalar_prefetch = 0 : i64, scratch_operands = 0 : i64, tpu.core_type = #tpu.core_type<tc>, window_params = [{transform_indices = @transform_0, window_bounds = array<i64: 1, 32, 1024>}, {pipeline_mode = #tpu.pipeline_mode<synchronous>, transform_indices = @transform_1, window_bounds = array<i64: 32, 32>}, {pipeline_mode = #tpu.pipeline_mode<synchronous>, transform_indices = @transform_2, window_bounds = array<i64: 32, 1>}, {pipeline_mode = #tpu.pipeline_mode<synchronous>, transform_indices = @transform_3, window_bounds = array<i64: 32, 32>}, {pipeline_mode = #tpu.pipeline_mode<synchronous>, transform_indices = @transform_4, window_bounds = array<i64: 32, 1>}, {transform_indices = @transform_5, window_bounds = array<i64: 1, 32, 1024>}]} {
    %c0 = arith.constant 0 : index
    %c0_0 = arith.constant 0 : index
    %c0_1 = arith.constant 0 : index
    %0 = vector.load %arg2[%c0, %c0_0, %c0_1] : memref<1x32x1024xf32, #tpu.memory_space<vmem>>, vector<1x32x1024xf32>
    %1 = vector.shape_cast %0 : vector<1x32x1024xf32> to vector<32x1024xf32>
    %c0_2 = arith.constant 0 : index
    %c0_3 = arith.constant 0 : index
    %2 = vector.load %arg3[%c0_2, %c0_3] : memref<32x32xf32, #tpu.memory_space<vmem>>, vector<32x32xf32>
    %cst = arith.constant dense<0.000000e+00> : vector<32x1024xf32>
    %3 = tpu.matmul %2, %1, %cst {dimension_numbers = #tpu.dot_dimension_numbers<[1], [0], [0], [1], [0, 0, 1, 1], [], []>} : vector<32x32xf32>, vector<32x1024xf32>, vector<32x1024xf32> -> vector<32x1024xf32>
    %c0_4 = arith.constant 0 : index
    %c0_5 = arith.constant 0 : index
    %4 = vector.load %arg4[%c0_4, %c0_5] : memref<32x1xf32, #tpu.memory_space<vmem>>, vector<32x1xf32>
    %5 = vector.broadcast %4 : vector<32x1xf32> to vector<32x1024xf32>
    %6 = arith.addf %3, %5 : vector<32x1024xf32>
    %cst_6 = arith.constant 5.000000e-01 : f32
    %7 = vector.broadcast %cst_6 : f32 to vector<32x1024xf32>
    %8 = arith.mulf %7, %6 : vector<32x1024xf32>
    %cst_7 = arith.constant 0.707106769 : f32
    %9 = vector.broadcast %cst_7 : f32 to vector<32x1024xf32>
    %10 = arith.mulf %6, %9 : vector<32x1024xf32>
    %11 = math.erf %10 : vector<32x1024xf32>
    %cst_8 = arith.constant 1.000000e+00 : f32
    %12 = vector.broadcast %cst_8 : f32 to vector<32x1024xf32>
    %13 = arith.addf %12, %11 : vector<32x1024xf32>
    %14 = arith.mulf %8, %13 : vector<32x1024xf32>
    %c0_9 = arith.constant 0 : index
    %c0_10 = arith.constant 0 : index
    %15 = vector.load %arg5[%c0_9, %c0_10] : memref<32x32xf32, #tpu.memory_space<vmem>>, vector<32x32xf32>
    %cst_11 = arith.constant dense<0.000000e+00> : vector<32x1024xf32>
    %16 = tpu.matmul %15, %14, %cst_11 {dimension_numbers = #tpu.dot_dimension_numbers<[1], [0], [0], [1], [0, 0, 1, 1], [], []>} : vector<32x32xf32>, vector<32x1024xf32>, vector<32x1024xf32> -> vector<32x1024xf32>
    %c0_12 = arith.constant 0 : index
    %c0_13 = arith.constant 0 : index
    %17 = vector.load %arg6[%c0_12, %c0_13] : memref<32x1xf32, #tpu.memory_space<vmem>>, vector<32x1xf32>
    %18 = vector.broadcast %17 : vector<32x1xf32> to vector<32x1024xf32>
    %19 = arith.addf %16, %18 : vector<32x1024xf32>
    %20 = arith.addf %19, %1 : vector<32x1024xf32>
    %c0_14 = arith.constant 0 : index
    %c0_15 = arith.constant 0 : index
    %c0_16 = arith.constant 0 : index
    %21 = vector.load %arg7[%c0_14, %c0_15, %c0_16] : memref<1x32x1024xf32, #tpu.memory_space<vmem>>, vector<1x32x1024xf32>
    %22 = vector.shape_cast %21 : vector<1x32x1024xf32> to vector<32x1024xf32>
    %23 = vector.shape_cast %20 : vector<32x1024xf32> to vector<1x32x1024xf32>
    tpu.vector_store %arg7[%c0_14, %c0_15, %c0_16], %23 {strides = array<i32>} : memref<1x32x1024xf32, #tpu.memory_space<vmem>>, vector<1x32x1024xf32>,
    return
  }
  func.func @transform_0(%arg0: i32, %arg1: i32) -> (i32, i32, i32) {
    %c0_i32 = arith.constant 0 : i32
    %c0_i32_0 = arith.constant 0 : i32
    return %arg0, %c0_i32, %arg1 : i32, i32, i32
  }
  func.func @transform_1(%arg0: i32, %arg1: i32) -> (i32, i32) {
    %c0_i32 = arith.constant 0 : i32
    %c0_i32_0 = arith.constant 0 : i32
    %c0_i32_1 = arith.constant 0 : i32
    return %c0_i32, %c0_i32_0 : i32, i32
  }
  func.func @transform_2(%arg0: i32, %arg1: i32) -> (i32, i32) {
    %c0_i32 = arith.constant 0 : i32
    %c0_i32_0 = arith.constant 0 : i32
    %c0_i32_1 = arith.constant 0 : i32
    return %c0_i32, %c0_i32_0 : i32, i32
  }
  func.func @transform_3(%arg0: i32, %arg1: i32) -> (i32, i32) {
    %c0_i32 = arith.constant 0 : i32
    %c0_i32_0 = arith.constant 0 : i32
    %c0_i32_1 = arith.constant 0 : i32
    return %c0_i32, %c0_i32_0 : i32, i32
  }
  func.func @transform_4(%arg0: i32, %arg1: i32) -> (i32, i32) {
    %c0_i32 = arith.constant 0 : i32
    %c0_i32_0 = arith.constant 0 : i32
    %c0_i32_1 = arith.constant 0 : i32
    return %c0_i32, %c0_i32_0 : i32, i32
  }
  func.func @transform_5(%arg0: i32, %arg1: i32) -> (i32, i32, i32) {
    %c0_i32 = arith.constant 0 : i32
    %c0_i32_0 = arith.constant 0 : i32
    return %arg0, %c0_i32, %arg1 : i32, i32, i32
  }
}

</mosaic_0001>

<bundles_post_ra>
// kernel: tpu_custom_call.1
= control target key start
LH: loop header
LB: loop body
LE: loop exit
PB: predicated region body
PF: predicated region fallthrough
CT: control target
= control target key end

     0   :  { %10 = vsyncpa [#allocation3], 0  ;;  %s2514_s0 = inlined_call_operand.hbm [shape: f32[2,32,1024], index: 0, kind: input, shape index: {}]   ;;  %s2515_s1 = inlined_call_operand.vmem [shape: f32[32,32], index: 1, kind: input, shape index: {}]   ;;  %s2516_s2 = inlined_call_operand.vmem [shape: f32[32,1], index: 2, kind: input, shape index: {}]   ;;  %s2517_s3 = inlined_call_operand.vmem [shape: f32[32,32], index: 3, kind: input, shape index: {}]   ;;  %s2518_s4 = inlined_call_operand.vmem [shape: f32[32,1], index: 4, kind: input, shape index: {}]   ;;  %s2519_s5 = inlined_call_operand.hbm [shape: f32[2,32,1024], index: 5, kind: output, shape index: {}]  }
   0x1   :  { %12 = vsyncpa [#allocation3 + $0x1], 0 }
   0x2   :  { %13 = vsyncpa [#allocation4], 0 }
   0x3   :  { %15 = vsyncpa [#allocation4 + $0x1], 0  ;;  %s1818_s18 = smov 0   ;;  %s1820_s19 = smov 0  }
   0x4   :  { %s1822_s20 = smov 0   ;;  %s1824_s21 = smov 0  }
   0x5   :  { %s1826_s22 = smov 0   ;;  %s1828_s23 = smov 0  }
   0x6 LB: > { %s1415_s24 = sadd.s32 4294967295, %s1778_s23   ;;  %s1416_s25 = sadd.s32 4294967294, %s1778_s23   ;;  %s1778_s23 = sphi %s1828_s23, %s21_s23   ;;  %s1774_s22 = sphi %s1826_s22, %s2596_s22   ;;  %s1770_s21 = sphi %s1824_s21, %s2595_s21   ;;  %s1766_s20 = sphi %s1822_s20, %s2594_s20   ;;  %s1762_s19 = sphi %s1820_s19, %s2593_s19   ;;  %s1758_s18 = sphi %s1818_s18, %s2592_s18  }
   0x7   : > { %s33_s26 = sadd.s32 1, %s1774_s22  ;;  %s42_s27 = sadd.s32 1, %s1766_s20 }
   0x8   : > { %p35_p0 = scmp.ge.s32.totalorder %s33_s26, 2  ;;  %p49_p1 = scmp.ne.s32.totalorder %s1766_s20, %s1762_s19 }
   0x9   : > { %p50_p2 = scmp.eq.s32.totalorder %s1778_s23, 0  ;;  %p55_p3 = scmp.ne.s32.totalorder %s1762_s19, %s1758_s18 }
   0xa   : > { %s2598_s26 = smov (%p35_p0, %s33_s26), 0  ;;  %p56_p5 = scmp.eq.s32.totalorder %s1415_s24, 0 }
   0xb   : > { %p1859_p4 = por %p50_p2, %p49_p1  ;;  %s37_s29 = ssub.s32 %s1774_s22, %s2598_s26 }
   0xc   : > { %p165_p6 = scmp.eq.s32.totalorder %s1415_s24, 1  ;;  %p40_p7 = scmp.eq.s32.totalorder %s37_s29, 0 }
   0xd   : > { %p1865_p8 = por %p56_p5, %p55_p3  ;;  %p171_p10 = scmp.eq.s32.totalorder %s1416_s25, 1 }
   0xe   : > { %p1869_p9 = por %p165_p6, %p49_p1  ;;  %p1540_p13 = scmp.lt.s32.totalorder %s1778_s23, 2 }
   0xf   : > { %s1874_s7 = scalar_select %p40_p7, %s1766_s20, %s42_s27  }
  0x10   : > { %s2544_s6 = scalar_select %p1869_p9, 1, 0 }
  0x11   : > { %p1876_p11 = por %p171_p10, %p55_p3  ;;  %s203_s9 = sand.u32 1, %s1766_s20  }
  0x12   : > { %s1419_s10 = sshll.u32 %s203_s9, 8  ;;  %s1462_s11 = sshll.u32 %s1774_s22, 12 }
  0x13   : > { %s2545_s8 = scalar_select %p1876_p11, 1, 0 }
  0x14   : > { %s1887_s14 = scalar_lea.hbm %s2514_s0, %s1462_s11  ;;  %s207_s15 = scalar_lea.vmem [#allocation2], %s1419_s10 }
  0x15   : > { %s216_s16 = sshll.u32 %s207_s15, 4  ;;  %p1893_p0 = pnand %p1540_p13, %p1859_p4  ;;  %s1889_s16 = int_to_ptr.vmem [resolvable:$true] %s216_s16 }
  0x16   : > { %s1898_s24 = scalar_lea.sflag [#allocation3], %s203_s9  ;;  %s1666_s25 = scalar_lea.hbm %s1887_s14, 4096 }
  0x17   : > { %p1667_p2 = scmp.ne.s32.totalorder %s1887_s14, %s1666_s25  ;;  %p1668_p3 = pneg %p1893_p0 }
  0x18   : > { %s1671_s28 = scalar_lea.hbm %s2514_s0, 8192  ;;  %p1672_p4 = scmp.lt.u32.totalorder %s1887_s14, %s2514_s0 }
  0x19   : > { %p1669_p5 = pnand %p1668_p3, %p1667_p2  ;;  %p1673_p7 = scmp.lt.u32.totalorder %s1671_s28, %s1666_s25 }
  0x1a   : > { %p1675_p13 = scmp.lt.u32.totalorder %s1666_s25, %s1887_s14 }
  0x1b   : > { %p1670_p6 = pneg %p1669_p5  ;;  %p1674_p10 = por %p1673_p7, %p1672_p4 }
  0x1d   : > { %p1676_p12 = por %p1675_p13, %p1674_p10 }
  0x1f   : > { %p1677_p1 = pnand %p1676_p12, %p1670_p6 }
  0x21   : > { %1680 = shalt.err (!%p1677_p1)
}
  0x22   : > { %s1681_s9 = scalar_lea.vmem %s1889_s16, 4096  ;;  %s1780_s12 = smov [#allocation2]  }
  0x23   : > { %p1682_p2 = scmp.ne.s32.totalorder %s1889_s16, %s1681_s9  ;;  %s1686_s13 = sshll.u32 %s1780_s12, 4  ;;  %s1687_s13 = int_to_ptr.vmem [resolvable:$false] %s1686_s13 }
  0x24   : > { %s1688_s15 = scalar_lea.vmem %s1687_s13, 8192  ;;  %p1689_p9 = scmp.lt.s32.totalorder %s1889_s16, %s1687_s13 }
  0x25   : > { %p1684_p5 = pnand %p1682_p2, %p1668_p3  ;;  %p1690_p4 = scmp.lt.s32.totalorder %s1688_s15, %s1681_s9 }
  0x27   : > { %p1685_p11 = pneg %p1684_p5  ;;  %p1691_p7 = por %p1690_p4, %p1689_p9 }
  0x29   : > { %p1692_p10 = pnand %p1691_p7, %p1685_p11 }
  0x2b   : > { %1695 = shalt.err (!%p1692_p10)
}
  0x2c   : > { %s1781_s25 = smov 1024   ;;  %s1782_s27 = smov 64  }
  0x2d   : > { %1535 = dma.hbm_to_vmem [thread:$0]  (!%p1893_p0), %s1887_s14, 4096, %s1889_s16, %s1898_s24, %s1781_s25, %s1781_s25, %s1782_s27  }
  0x2e   : > { %p224_p12 = scmp.lt.s32.totalorder %s1778_s23, 3  ;;  %p2547_p1 = scmp.ge.s32.totalorder %s1778_s23, 1 }
  0x30   : > { %p225_p3 = pnand %p2547_p1, %p224_p12 }
  0x32   : > { %228 = sbr.rel (%p225_p3) target bundleno = 596 (0x254), region = 40 }
  0x39   : > { %s1930_s29 = sand.u32 1, %s1762_s19  }
  0x3a   : > { %s1423_s28 = sshll.u32 %s1930_s29, 8  ;;  %s231_s10 = scalar_lea.sflag [#allocation3], %s1930_s29 }
  0x3b   : > { %s1936_s11 = scalar_lea.vmem [#allocation2], %s1423_s28 }
  0x3c   : > { %1749 = dma.done.wait (%p1865_p8), %s231_s10, 4096  }
  0x3d   : > { %1751 = vsyncadd (%p1865_p8), %s231_s10, 4294963200  ;;  %v2521_v0 = vmov 0.0   ;;  %v1784_v1 = vmov 0   ;;  %v1945_v2 = vld [vmem:[%s1936_s11 + $0x8] sm:$0xff]  ;;  %v1951_v4 = vld [vmem:[%s1936_s11 + $0x18] sm:$0xff]  ;;  %vm323_vm0 = vcmask 261120  }
  0x3e   : > { %400 = vmatprep.mubr.f32.mxu0 %v2521_v0  ;;  %489 = vmatprep.mubr.f32.mxu1 %v2521_v0  ;;  %v1948_v3 = vld [vmem:[%s1936_s11 + $0x48] sm:$0xff]  ;;  %v1956_v6 = vld [vmem:[%s1936_s11 + $0x58] sm:$0xff]  ;;  %v1959_v7 = vld [vmem:[%s1936_s11] sm:$0xff]  ;;  %s2364_s15 = scalar_lea.vmem [#allocation5], %s1423_s28  ;;  %s1463_s28 = sshll.u32 %s1770_s21, 12 }
  0x3f   : > { %1596 = vset.pattern.permute.xlu0 %v1784_v1  ;;  %1597 = vset.pattern.permute.xlu1 %v1784_v1  ;;  %v1464_v5 = vpack.c.bf16 %v1948_v3, %v1945_v2  ;;  %v1962_v8 = vld [vmem:[%s1936_s11 + $0x40] sm:$0xff]  ;;  %v1472_v9 = vpack.c.bf16 %v1956_v6, %v1951_v4  ;;  %v1969_v11 = vld [vmem:[%s1936_s11 + $0x10] sm:$0xff]  ;;  %v1975_v13 = vld [vmem:[%s1936_s11 + $0x88] sm:$0xff]  ;;  %s1328_s25 = sshll.u32 %s2364_s15, 4  ;;  %s2458_s10 = scalar_lea.hbm %s2519_s5, %s1463_s28  ;;  %s2460_s25 = int_to_ptr.vmem [resolvable:$true] %s1328_s25 }
  0x40   : > { %v1466_v10 = vpack.c.bf16 %v1962_v8, %v1959_v7  ;;  %v1972_v12 = vld [vmem:[%s1936_s11 + $0x50] sm:$0xff]  ;;  %2548 = vst [vmem:[#allocation8_spill] sm:$0xff] %v1975_v13  ;;  %v1980_v15 = vld [vmem:[%s1936_s11 + $0xc8] sm:$0xff]  ;;  %v1983_v16 = vld [vmem:[%s1936_s11 + $0x98] sm:$0xff]  ;;  %s1313_s30 = scalar_lea.sflag [#allocation4], %s1930_s29  ;;  %s1696_s14 = scalar_lea.vmem %s2460_s25, 4096 }
  0x41   : > { %1465 = vmatprep.subr.bf16.mxu0 %v1464_v5  ;;  %v1474_v14 = vpack.c.bf16 %v1972_v12, %v1969_v11  ;;  %2549 = vst [vmem:[#allocation9_spill] sm:$0xff] %v1980_v15  ;;  %2550 = vst [vmem:[#allocation10_spill] sm:$0xff] %v1983_v16  ;;  %v1986_v17 = vld [vmem:[%s1936_s11 + $0xd8] sm:$0xff]  ;;  %1473 = vmatprep.subr.bf16.mxu1 %v1472_v9  ;;  %v1468_v18 = vpack.c.bf16 %v1980_v15, %v1975_v13  ;;  %v1993_v20 = vld [vmem:[%s1936_s11 + $0x80] sm:$0xff]  ;;  %p1697_p8 = scmp.ne.s32.totalorder %s2460_s25, %s1696_s14  ;;  %p2589_p9 = scmp.ne.s32.totalorder %s2544_s6, 0 }
  0x42   : > { %2551 = vst [vmem:[#allocation11_spill] sm:$0xff] %v1986_v17  ;;  %1467 = vmatpush1.bf16.msra.mxu0 %v1466_v10  ;;  %v1476_v19 = vpack.c.bf16 %v1986_v17, %v1983_v16  ;;  %v1996_v21 = vld [vmem:[%s1936_s11 + $0xc0] sm:$0xff]  ;;  %v1999_v22 = vld [vmem:[%s1936_s11 + $0x90] sm:$0xff]  ;;  %v2009_v26 = vld [vmem:[%s1936_s11 + $0x28] sm:$0xff]  ;;  %s1785_s16 = smov [#allocation5]  }
  0x43   : > { %2552 = vst [vmem:[#allocation12_spill] sm:$0xff] %v1996_v21  ;;  %2553 = vst [vmem:[#allocation13_spill] sm:$0xff] %v1999_v22  ;;  %1475 = vmatpush1.bf16.msra.mxu1 %v1474_v14  ;;  %v1470_v23 = vpack.c.bf16 %v1996_v21, %v1993_v20  ;;  %v2004_v24 = vld [vmem:[%s1936_s11 + $0xd0] sm:$0xff]  ;;  %1469 = vmatprep.subr.bf16.mxu0 %v1468_v18  ;;  %v2012_v27 = vld [vmem:[%s1936_s11 + $0x68] sm:$0xff]  ;;  %p1698_p11 = pnand %p1697_p8, %p2589_p9  ;;  %s1700_s17 = sshll.u32 %s1785_s16, 4  ;;  %s1701_s17 = int_to_ptr.vmem [resolvable:$false] %s1700_s17 }
  0x44   : > { %2554 = vst [vmem:[#allocation14_spill] sm:$0xff] %v2004_v24  ;;  %1477 = vmatprep.subr.bf16.mxu1 %v1476_v19  ;;  %v1478_v25 = vpack.c.bf16 %v2004_v24, %v1999_v22  ;;  %2555 = vst [vmem:[#allocation15_spill] sm:$0xff] %v2009_v26  ;;  %v2015_v28 = vld [vmem:[%s1936_s11 + $0x38] sm:$0xff]  ;;  %v1480_v29 = vpack.c.bf16 %v2012_v27, %v2009_v26  ;;  %v2023_v31 = vld [vmem:[%s1936_s11 + $0x20] sm:$0xff]  ;;  %s1702_s24 = scalar_lea.vmem %s1701_s17, 8192  ;;  %p1703_p6 = scmp.lt.s32.totalorder %s2460_s25, %s1701_s17 }
  0x45   : > { %2556 = vst [vmem:[#allocation16_spill] sm:$0xff] %v2012_v27  ;;  %2557 = vst [vmem:[#allocation17_spill] sm:$0xff] %v2015_v28  ;;  %v2020_v30 = vld [vmem:[%s1936_s11 + $0x78] sm:$0xff]  ;;  %v2026_v32 = vld [vmem:[%s1936_s11 + $0x60] sm:$0xff]  ;;  %p1699_p0 = pneg %p1698_p11  ;;  %p1704_p13 = scmp.lt.s32.totalorder %s1702_s24, %s1696_s14 }
  0x46   : > { %2558 = vst [vmem:[#allocation18_spill] sm:$0xff] %v2020_v30  ;;  %2559 = vst [vmem:[#allocation19_spill] sm:$0xff] %v2023_v31  ;;  %1471 = vmatpush1.bf16.msra.mxu0 %v1470_v23  ;;  %v295_v33 = vld [vmem:[%s2515_s1] sm:$0xff]  ;;  %v1488_v34 = vpack.c.bf16 %v2020_v30, %v2015_v28  ;;  %v2034_v35 = vld [vmem:[%s1936_s11 + $0x30] sm:$0xff]  ;;  %v1482_v37 = vpack.c.bf16 %v2026_v32, %v2023_v31 }
  0x47   : > { %2560 = vst [vmem:[#allocation20_spill] sm:$0xff] %v2026_v32  ;;  %2561 = vst [vmem:[#allocation21_spill] sm:$0xff] %v2034_v35  ;;  %v2037_v36 = vld [vmem:[%s1936_s11 + $0x70] sm:$0xff]  ;;  %1479 = vmatpush1.bf16.msra.mxu1 %v1478_v25  ;;  %1481 = vmatprep.subr.bf16.mxu0 %v1480_v29  ;;  %v2042_v38 = vld [vmem:[%s1936_s11 + $0xa8] sm:$0xff]  ;;  %p1705_p2 = por %p1704_p13, %p1703_p6 }
  0x48   : > { %2562 = vst [vmem:[#allocation22_spill] sm:$0xff] %v2037_v36  ;;  %2563 = vst [vmem:[#allocation23_spill] sm:$0xff] %v2042_v38  ;;  %v292_v39 = vld [vmem:[%s1936_s11 + $0xe8] sm:$0xff]  ;;  %1489 = vmatprep.subr.bf16.mxu1 %v1488_v34  ;;  %v1490_v40 = vpack.c.bf16 %v2037_v36, %v2034_v35  ;;  %v2049_v42 = vld [vmem:[%s1936_s11 + $0xb8] sm:$0xff] }
  0x49   : > { %v1484_v41 = vpack.c.bf16 %v292_v39, %v2042_v38  ;;  %2564 = vst [vmem:[#allocation24_spill] sm:$0xff] %v2049_v42  ;;  %v294_v43 = vld [vmem:[%s1936_s11 + $0xf8] sm:$0xff]  ;;  %v2053_v44 = vld [vmem:[%s1936_s11 + $0xa0] sm:$0xff]  ;;  %1425 = vmatmul.mubr.msk.f32.vlgmr.msra.gmra.mrb[0].mxu0 %vm323_vm0, %v295_v33  ;;  %v2059_v47 = vld [vmem:[%s1936_s11 + $0xb0] sm:$0xff]  ;;  %p1706_p5 = pnand %p1705_p2, %p1699_p0 }
  0x4a   : > { %2565 = vst [vmem:[#allocation25_spill] sm:$0xff] %v2053_v44  ;;  %v1492_v45 = vpack.c.bf16 %v294_v43, %v2049_v42  ;;  %v291_v46 = vld [vmem:[%s1936_s11 + $0xe0] sm:$0xff]  ;;  %2566 = vst [vmem:[#allocation26_spill] sm:$0xff] %v2059_v47  ;;  %v293_v48 = vld [vmem:[%s1936_s11 + $0xf0] sm:$0xff]  ;;  %1429 = vmatmul.mubr.msk.f32.vlgmr.msra.gmra.mrb[0].mxu1 %vm323_vm0, %v295_v33  ;;  %406 = vmatprep.mubr.f32.mxu0 %v2521_v0 }
  0x4b   : > { %v296_v49 = vld [vmem:[%s2515_s1 + $0x8] sm:$0xff]  ;;  %495 = vmatprep.mubr.f32.mxu1 %v2521_v0  ;;  %1483 = vmatpush1.bf16.msra.mxu0 %v1482_v37  ;;  %v1486_v50 = vpack.c.bf16 %v291_v46, %v2053_v44  ;;  %v1494_v51 = vpack.c.bf16 %v293_v48, %v2059_v47  ;;  %v299_v52 = vld [vmem:[%s2516_s2] sm:$0xff]  ;;  %v297_v53 = vld [vmem:[%s2515_s1 + $0x10] sm:$0xff] }
  0x4c   : > { %1491 = vmatpush1.bf16.msra.mxu1 %v1490_v40  ;;  %1485 = vmatprep.subr.bf16.mxu0 %v1484_v41  ;;  %v301_v54 = vld [vmem:[%s2516_s2 + $0x10] sm:$0xff]  ;;  %v300_v55 = vld [vmem:[%s2516_s2 + $0x8] sm:$0xff]  ;;  %v298_v56 = vld [vmem:[%s2515_s1 + $0x18] sm:$0xff] }
  0x4d   : > { %1426 = vmatmul.mubr.msk.f32.gmra.mrb[2].mxu0 %vm323_vm0, %v296_v49  ;;  %1493 = vmatprep.subr.bf16.mxu1 %v1492_v45  ;;  %v302_v57 = vld [vmem:[%s2516_s2 + $0x18] sm:$0xff]  ;;  %v856_v58 = vld [vmem:[%s2518_s4] sm:$0xff]  ;;  %v857_v59 = vld [vmem:[%s2518_s4 + $0x8] sm:$0xff] }
  0x4e   : > { %1430 = vmatmul.mubr.msk.f32.gmra.mrb[2].mxu1 %vm323_vm0, %v296_v49  ;;  %412 = vmatprep.mubr.f32.mxu0 %v2521_v0  ;;  %v858_v60 = vld [vmem:[%s2518_s4 + $0x10] sm:$0xff]  ;;  %v859_v61 = vld [vmem:[%s2518_s4 + $0x18] sm:$0xff] }
  0x4f   : > { %501 = vmatprep.mubr.f32.mxu1 %v2521_v0  ;;  %1487 = vmatpush1.bf16.msra.mxu0 %v1486_v50 }
  0x50   : > { %1495 = vmatpush1.bf16.msra.mxu1 %v1494_v51  ;;  %305 = vperm.xlu0 %1596, %v299_v52  }
  0x51   : > { %1427 = vmatmul.mubr.msk.f32.gmra.mrb[4].mxu0 %vm323_vm0, %v297_v53  ;;  %315 = vperm.xlu1 %1597, %v301_v54  }
  0x52   : > { %1431 = vmatmul.mubr.msk.f32.gmra.mrb[4].mxu1 %vm323_vm0, %v297_v53  ;;  %418 = vmatprep.mubr.f32.mxu0 %v2521_v0 }
  0x53   : > { %507 = vmatprep.mubr.f32.mxu1 %v2521_v0 }
  0x54   : > { %310 = vperm.xlu0 %1596, %v300_v55  }
  0x55   : > { %1428 = vmatmul.mubr.msk.f32.gmra.mrb[6].mxu0 %vm323_vm0, %v298_v56  ;;  %320 = vperm.xlu1 %1597, %v302_v57  }
  0x56   : > { %1432 = vmatmul.mubr.msk.f32.gmra.mrb[6].mxu1 %vm323_vm0, %v298_v56  ;;  %578 = vmatprep.mubr.f32.mxu0 %v2521_v0 }
  0x57   : > { %667 = vmatprep.mubr.f32.mxu1 %v2521_v0 }
  0x58   : > { %862 = vperm.xlu0 %1596, %v856_v58  }
  0x59   : > { %1433 = vmatmul.mubr.msk.f32.vlgmr.msra.gmra.mrb[8].mxu0 %vm323_vm0, %v295_v33  ;;  %867 = vperm.xlu1 %1597, %v857_v59  }
  0x5a   : > { %1437 = vmatmul.mubr.msk.f32.vlgmr.msra.gmra.mrb[8].mxu1 %vm323_vm0, %v295_v33  ;;  %584 = vmatprep.mubr.f32.mxu0 %v2521_v0 }
  0x5b   : > { %673 = vmatprep.mubr.f32.mxu1 %v2521_v0 }
  0x5c   : > { %872 = vperm.xlu0 %1596, %v858_v60  }
  0x5d   : > { %1434 = vmatmul.mubr.msk.f32.gmra.mrb[10].mxu0 %vm323_vm0, %v296_v49  ;;  %877 = vperm.xlu1 %1597, %v859_v61  }
  0x5e   : > { %1438 = vmatmul.mubr.msk.f32.gmra.mrb[10].mxu1 %vm323_vm0, %v296_v49  ;;  %590 = vmatprep.mubr.f32.mxu0 %v2521_v0 }
  0x5f   : > { %679 = vmatprep.mubr.f32.mxu1 %v2521_v0 }
  0x61   : > { %1435 = vmatmul.mubr.msk.f32.gmra.mrb[12].mxu0 %vm323_vm0, %v297_v53 }
  0x62   : > { %1439 = vmatmul.mubr.msk.f32.gmra.mrb[12].mxu1 %vm323_vm0, %v297_v53  ;;  %596 = vmatprep.mubr.f32.mxu0 %v2521_v0 }
  0x63   : > { %685 = vmatprep.mubr.f32.mxu1 %v2521_v0 }
  0x65   : > { %1436 = vmatmul.mubr.msk.f32.gmra.mrb[14].mxu0 %vm323_vm0, %v298_v56 }
  0x66   : > { %1440 = vmatmul.mubr.msk.f32.gmra.mrb[14].mxu1 %vm323_vm0, %v298_v56  ;;  %956 = vmatprep.mubr.f32.mxu0 %v2521_v0 }
  0x67   : > { %1045 = vmatprep.mubr.f32.mxu1 %v2521_v0 }
  0xcf   : > { %v2128_v62 = vpop.permute.xlu0 %305 }
  0xd0   : > { %v2139_v48 = vpop.permute.xlu1 %315 }
  0xd3   : > { %v2134_v25 = vpop.permute.xlu0 %310 }
 0x11c   : > { %v402_v63 = vpop.f32.mrb[0].mxu0 }
 0x11d   : > { %v403_v1 = vadd.f32 %v402_v63, %v2128_v62  ;;  %v491_v5 = vpop.f32.mrb[0].mxu1  ;;  %v404_v9 = vpop.f32.mrb[1].mxu0 }
 0x11e   : > { %v492_v10 = vadd.f32 %v491_v5, %v2128_v62  ;;  %v405_v14 = vadd.f32 %v404_v9, %v2128_v62  ;;  %v493_v18 = vpop.f32.mrb[1].mxu1 }
 0x11f   : > { %v724_v19 = vmul.f32 0.70710677, %v403_v1  ;;  %v494_v23 = vadd.f32 %v493_v18, %v2128_v62  ;;  %v692_v9 = vmul.f32 0.5, %v403_v1 }
 0x120   : > { %v726_v29 = vmul.f32 0.70710677, %v492_v10  ;;  %v725_v33 = vmul.f32 0.70710677, %v405_v14  ;;  %v408_v37 = vpop.f32.mrb[2].mxu0  ;;  %v694_v18 = vmul.f32 0.5, %v492_v10 }
 0x121   : > { %1598 = verf.f32 %v724_v19  ;;  %v727_v34 = vmul.f32 0.70710677, %v494_v23  ;;  %v497_v39 = vpop.f32.mrb[2].mxu1  ;;  %v409_v40 = vadd.f32 %v408_v37, %v2134_v25  ;;  %v410_v43 = vpop.f32.mrb[3].mxu0  ;;  %v2148_v37 = vmul.f32 0.5, %v405_v14 }
 0x122   : > { %1600 = verf.f32 %v726_v29  ;;  %v498_v41 = vadd.f32 %v497_v39, %v2134_v25  ;;  %v499_v45 = vpop.f32.mrb[3].mxu1  ;;  %v411_v46 = vadd.f32 %v410_v43, %v2134_v25 }
 0x123   : > { %1602 = verf.f32 %v725_v33  ;;  %v732_v49 = vmul.f32 0.70710677, %v409_v40  ;;  %v500_v50 = vadd.f32 %v499_v45, %v2134_v25 }
 0x124   : > { %v414_v51 = vpop.f32.mrb[4].mxu0  ;;  %1604 = verf.f32 %v727_v34  ;;  %v734_v52 = vmul.f32 0.70710677, %v498_v41  ;;  %v733_v53 = vmul.f32 0.70710677, %v411_v46  ;;  %v2146_v34 = vpop.permute.xlu1 %320 }
 0x125   : > { %1606 = verf.f32 %v732_v49  ;;  %v415_v54 = vadd.f32 %v414_v51, %v2139_v48  ;;  %v503_v55 = vpop.f32.mrb[4].mxu1  ;;  %v416_v56 = vpop.f32.mrb[5].mxu0  ;;  %v735_v60 = vmul.f32 0.70710677, %v500_v50  ;;  %v2150_v51 = vmul.f32 0.5, %v494_v23 }
 0x126   : > { %1608 = verf.f32 %v734_v52  ;;  %v504_v57 = vadd.f32 %v503_v55, %v2139_v48  ;;  %v417_v58 = vadd.f32 %v416_v56, %v2139_v48  ;;  %v505_v59 = vpop.f32.mrb[5].mxu1  ;;  %v702_v55 = vmul.f32 0.5, %v498_v41 }
 0x127   : > { %v740_v61 = vmul.f32 0.70710677, %v415_v54  ;;  %v506_v63 = vadd.f32 %v505_v59, %v2139_v48  ;;  %1610 = verf.f32 %v733_v53  ;;  %v700_v53 = vmul.f32 0.5, %v409_v40 }
 0x128   : > { %v420_v5 = vpop.f32.mrb[6].mxu0  ;;  %v742_v19 = vmul.f32 0.70710677, %v504_v57  ;;  %v741_v39 = vmul.f32 0.70710677, %v417_v58  ;;  %v2155_v59 = vmul.f32 0.5, %v411_v46 }
 0x129   : > { %v509_v29 = vpop.f32.mrb[6].mxu1  ;;  %v422_v33 = vpop.f32.mrb[7].mxu0  ;;  %1612 = verf.f32 %v740_v61  ;;  %v743_v43 = vmul.f32 0.70710677, %v506_v63  ;;  %v421_v52 = vadd.f32 %v420_v5, %v2146_v34  ;;  %v2158_v5 = vmul.f32 0.5, %v500_v50 }
 0x12a   : > { %v511_v45 = vpop.f32.mrb[7].mxu1  ;;  %1614 = verf.f32 %v742_v19  ;;  %v510_v1 = vadd.f32 %v509_v29, %v2146_v34  ;;  %v423_v56 = vadd.f32 %v422_v33, %v2146_v34  ;;  %v2160_v47 = vmul.f32 0.5, %v415_v54 }
 0x12b   : > { %v1599_v49 = vpop.eup %1598  ;;  %1616 = verf.f32 %v735_v60  ;;  %v748_v61 = vmul.f32 0.70710677, %v421_v52  ;;  %v512_v0 = vadd.f32 %v511_v45, %v2146_v34  ;;  %v2162_v33 = vmul.f32 0.5, %v504_v57 }
 0x12c   : > { %v1601_v10 = vpop.eup %1600  ;;  %v580_v14 = vpop.f32.mrb[8].mxu0  ;;  %1618 = verf.f32 %v741_v39  ;;  %v788_v38 = vadd.f32 1.0, %v1599_v49  ;;  %v750_v29 = vmul.f32 0.70710677, %v510_v1  ;;  %v2164_v39 = vmul.f32 0.5, %v417_v58 }
 0x12d   : > { %v669_v23 = vpop.f32.mrb[8].mxu1  ;;  %v582_v42 = vpop.f32.mrb[9].mxu0  ;;  %1620 = verf.f32 %v743_v43  ;;  %v790_v60 = vadd.f32 1.0, %v1601_v10  ;;  %v2166_v45 = vmul.f32 0.5, %v506_v63  ;;  %v749_v44 = vmul.f32 0.70710677, %v423_v56 }
 0x12e   : > { %v1603_v19 = vpop.eup %1602  ;;  %v671_v40 = vpop.f32.mrb[9].mxu1  ;;  %1622 = verf.f32 %v748_v61  ;;  %v2168_v43 = vmul.f32 0.5, %v421_v52  ;;  %v751_v27 = vmul.f32 0.70710677, %v512_v0  ;;  %v581_v10 = vadd.f32 %v580_v14, %v2128_v62 }
 0x12f   : > { %v1605_v41 = vpop.eup %1604  ;;  %1624 = verf.f32 %v750_v29  ;;  %v2171_v57 = vmul.f32 %v788_v38, %v692_v9  ;;  %v789_v61 = vadd.f32 1.0, %v1603_v19  ;;  %v670_v58 = vadd.f32 %v669_v23, %v2128_v62 }
 0x130   : > { %v1607_v46 = vpop.eup %1606  ;;  %v586_v49 = vpop.f32.mrb[10].mxu0  ;;  %v2176_v28 = vmul.f32 %v790_v60, %v694_v18  ;;  %v791_v26 = vadd.f32 1.0, %v1605_v41  ;;  %1626 = verf.f32 %v749_v44  ;;  %v728_v14 = vmul.f32 0.70710677, %v581_v10 }
 0x131   : > { %v1609_v50 = vpop.eup %1608  ;;  %v796_v30 = vadd.f32 1.0, %v1607_v46  ;;  %v675_v54 = vpop.f32.mrb[10].mxu1  ;;  %1628 = verf.f32 %v751_v27  ;;  %v583_v38 = vadd.f32 %v582_v42, %v2128_v62  ;;  %v2185_v31 = vmul.f32 0.5, %v423_v56 }
 0x132   : > { %v588_v36 = vpop.f32.mrb[11].mxu0  ;;  %v798_v32 = vadd.f32 1.0, %v1609_v50  ;;  %v2174_v63 = vpop.f32.mrb[11].mxu1  ;;  %v718_v50 = vmul.f32 0.5, %v510_v1  ;;  %v730_v18 = vmul.f32 0.70710677, %v670_v58  ;;  %1630 = verf.f32 %v728_v14 }
 0x133   : > { %v1611_v29 = vpop.eup %1610  ;;  %v2178_v46 = vmul.f32 %v796_v30, %v700_v53  ;;  %v2197_v1 = vmul.f32 %v791_v26, %v2150_v51  ;;  %v2199_v60 = vmul.f32 0.5, %v512_v0  ;;  %v2201_v15 = vmul.f32 0.5, %v581_v10 }
 0x134   : > { %v1613_v52 = vpop.eup %1612  ;;  %v2180_v35 = vmul.f32 %v798_v32, %v702_v55  ;;  %v592_v9 = vpop.f32.mrb[12].mxu0  ;;  %v2192_v32 = vmul.f32 %v789_v61, %v2148_v37  ;;  %v797_v42 = vadd.f32 1.0, %v1611_v29  ;;  %1632 = verf.f32 %v730_v18 }
 0x135   : > { %v1615_v19 = vpop.eup %1614  ;;  %v2187_v41 = vpop.f32.mrb[12].mxu1  ;;  %v804_v56 = vadd.f32 1.0, %v1613_v52  ;;  %v729_v37 = vmul.f32 0.70710677, %v583_v38  ;;  %v672_v61 = vadd.f32 %v671_v40, %v2128_v62  ;;  %v587_v27 = vadd.f32 %v586_v49, %v2134_v25 }
 0x136   : > { %v2189_v30 = vpop.f32.mrb[13].mxu0  ;;  %v1617_v44 = vpop.eup %1616  ;;  %v806_v17 = vadd.f32 1.0, %v1615_v19  ;;  %v676_v26 = vadd.f32 %v675_v54, %v2134_v25  ;;  %v589_v51 = vadd.f32 %v588_v36, %v2134_v25  ;;  %v829_v10 = vmul.f32 %v797_v42, %v2155_v59 }
 0x137   : > { %v683_v53 = vpop.f32.mrb[13].mxu1  ;;  %v1619_v55 = vpop.eup %1618  ;;  %v799_v14 = vadd.f32 1.0, %v1617_v44  ;;  %v2212_v21 = vmul.f32 0.5, %v670_v58  ;;  %1634 = verf.f32 %v729_v37  ;;  %v2215_v40 = vmul.f32 %v804_v56, %v2160_v47 }
 0x138   : > { %v1621_v23 = vpop.eup %1620  ;;  %v2204_v24 = vpop.f32.mrb[14].mxu0  ;;  %v731_v49 = vmul.f32 0.70710677, %v672_v61  ;;  %v736_v16 = vmul.f32 0.70710677, %v587_v27  ;;  %v2218_v54 = vmul.f32 %v806_v17, %v2162_v33  ;;  %v805_v36 = vadd.f32 1.0, %v1619_v55 }
 0x139   : > { %v1623_v29 = vpop.eup %1622  ;;  %v687_v0 = vpop.f32.mrb[14].mxu1  ;;  %v738_v22 = vmul.f32 0.70710677, %v676_v26  ;;  %v807_v42 = vadd.f32 1.0, %v1621_v23  ;;  %v737_v37 = vmul.f32 0.70710677, %v589_v51  ;;  %v831_v47 = vmul.f32 %v799_v14, %v2158_v5 }
 0x13a   : > { %v2209_v52 = vpop.f32.mrb[15].mxu0  ;;  %v1625_v18 = vpop.eup %1624  ;;  %v812_v19 = vadd.f32 1.0, %v1623_v29  ;;  %1636 = verf.f32 %v731_v49  ;;  %v678_v17 = vadd.f32 %v2174_v63, %v2134_v25  ;;  %v2233_v23 = vadd.f32 %v592_v9, %v2139_v48 }
 0x13b   : > { %v689_v62 = vpop.f32.mrb[15].mxu1  ;;  %v814_v44 = vadd.f32 1.0, %v1625_v18  ;;  %v1627_v59 = vpop.eup %1626  ;;  %1638 = verf.f32 %v736_v16  ;;  %v2236_v55 = vmul.f32 %v805_v36, %v2164_v39  ;;  %v2239_v16 = vmul.f32 %v807_v42, %v2166_v45 }
 0x13c   : > { %v2221_v13 = vmul.f32 %v812_v19, %v2168_v43  ;;  %v1629_v29 = vpop.eup %1628  ;;  %v697_v43 = vmul.f32 0.5, %v583_v38  ;;  %1640 = verf.f32 %v738_v22  ;;  %v813_v5 = vadd.f32 1.0, %v1627_v59 }
 0x13d   : > { %v2223_v58 = vmul.f32 %v814_v44, %v718_v50  ;;  %v1631_v50 = vpop.eup %1630  ;;  %1642 = verf.f32 %v737_v37  ;;  %v739_v14 = vmul.f32 0.70710677, %v678_v17  ;;  %v815_v25 = vadd.f32 1.0, %v1629_v29 }
 0x13e   : > { %v1502_v56 = vpack.c.bf16 %v2221_v13, %v2215_v40  ;;  %v1633_v18 = vpop.eup %1632  ;;  %v744_v63 = vmul.f32 0.70710677, %v2233_v23  ;;  %v2244_v22 = vadd.f32 %v2187_v41, %v2139_v48  ;;  %v699_v38 = vmul.f32 0.5, %v672_v61 }
 0x13f   : > { %v1510_v33 = vpack.c.bf16 %v2223_v58, %v2218_v54  ;;  %1644 = verf.f32 %v739_v14  ;;  %v2248_v39 = vadd.f32 %v2189_v30, %v2139_v48  ;;  %v2251_v9 = vadd.f32 %v683_v53, %v2139_v48  ;;  %v853_v58 = vld [vmem:[%s2517_s3 + $0x8] sm:$0xff] }
 0x140   : > { %v704_v19 = vmul.f32 0.5, %v587_v27  ;;  %v706_v44 = vmul.f32 0.5, %v676_v26  ;;  %v705_v45 = vmul.f32 0.5, %v589_v51  ;;  %v746_v49 = vmul.f32 0.70710677, %v2244_v22 }
 0x141   : > { %v1635_v36 = vpop.eup %1634  ;;  %v845_v59 = vmul.f32 %v813_v5, %v2185_v31  ;;  %v792_v42 = vadd.f32 1.0, %v1631_v50  ;;  %v794_v41 = vadd.f32 1.0, %v1633_v18  ;;  %v745_v61 = vmul.f32 0.70710677, %v2248_v39 }
 0x142   : > { %v847_v37 = vmul.f32 %v815_v25, %v2199_v60  ;;  %1646 = verf.f32 %v744_v63  ;;  %v747_v30 = vmul.f32 0.70710677, %v2251_v9  ;;  %v1496_v48 = vpack.c.bf16 %v829_v10, %v2192_v32 }
 0x143   : > { %v793_v53 = vadd.f32 1.0, %v1635_v36  ;;  %v1504_v27 = vpack.c.bf16 %v831_v47, %v2197_v1  ;;  %v2262_v26 = vadd.f32 %v2204_v24, %v2146_v34  ;;  %v2265_v31 = vadd.f32 %v687_v0, %v2146_v34 }
 0x144   : > { %v1637_v51 = vpop.eup %1636  ;;  %v707_v29 = vmul.f32 0.5, %v678_v17  ;;  %1648 = verf.f32 %v746_v49  ;;  %1497 = vmatprep.subr.bf16.mxu0 %v1496_v48  ;;  %v2269_v60 = vadd.f32 %v2209_v52, %v2146_v34  ;;  %v2272_v32 = vadd.f32 %v689_v62, %v2146_v34 }
 0x145   : > { %v1639_v10 = vpop.eup %1638  ;;  %v824_v1 = vmul.f32 %v792_v42, %v2201_v15  ;;  %v826_v24 = vmul.f32 %v794_v41, %v2212_v21  ;;  %1650 = verf.f32 %v745_v61  ;;  %1505 = vmatprep.subr.bf16.mxu1 %v1504_v27  ;;  %v752_v0 = vmul.f32 0.70710677, %v2262_v26 }
 0x146   : > { %v2567_v47 = vpack.c.bf16 %v2178_v46, %v2171_v57  ;;  %v1641_v17 = vpop.eup %1640  ;;  %v800_v50 = vadd.f32 1.0, %v1639_v10  ;;  %1652 = verf.f32 %v747_v30  ;;  %v754_v52 = vmul.f32 0.70710677, %v2265_v31 }
 0x147   : > { %v2568_v34 = vpack.c.bf16 %v2180_v35, %v2176_v28  ;;  %v753_v15 = vmul.f32 0.70710677, %v2269_v60  ;;  %v1643_v21 = vpop.eup %1642  ;;  %v825_v62 = vmul.f32 %v793_v53, %v697_v43  ;;  %v795_v5 = vadd.f32 1.0, %v1637_v51 }
 0x148   : > { %1499 = vmatpush1.bf16.msra.mxu0 %v2567_v47  ;;  %v802_v14 = vadd.f32 1.0, %v1641_v17  ;;  %1654 = verf.f32 %v752_v0  ;;  %v832_v18 = vmul.f32 %v800_v50, %v704_v19  ;;  %v801_v25 = vadd.f32 1.0, %v1643_v21 }
 0x149   : > { %1507 = vmatpush1.bf16.msra.mxu1 %v2568_v34  ;;  %1656 = verf.f32 %v754_v52  ;;  %v755_v57 = vmul.f32 0.70710677, %v2272_v32  ;;  %v1645_v46 = vpop.eup %1644  ;;  %v1500_v49 = vpack.c.bf16 %v845_v59, %v2236_v55  ;;  %v1508_v28 = vpack.c.bf16 %v847_v37, %v2239_v16  ;;  %v2297_v55 = vld [vmem:[%s2517_s3] sm:$0xff] }
 0x14a   : > { %v834_v63 = vmul.f32 %v802_v14, %v706_v44  ;;  %1658 = verf.f32 %v753_v15  ;;  %v1514_v35 = vpack.c.bf16 %v832_v18, %v824_v1  ;;  %v833_v36 = vmul.f32 %v801_v25, %v705_v45  ;;  %v855_v14 = vld [vmem:[%s2517_s3 + $0x18] sm:$0xff]  ;;  %v2350_v25 = vpop.permute.xlu0 %862 }
 0x14b   : > { %v803_v42 = vadd.f32 1.0, %v1645_v46  ;;  %1660 = verf.f32 %v755_v57  ;;  %1501 = vmatprep.subr.bf16.mxu0 %v1500_v49  ;;  %1509 = vmatprep.subr.bf16.mxu1 %v1508_v28  ;;  %v827_v19 = vmul.f32 %v795_v5, %v699_v38  ;;  %v2569_v54 = vmov 0.0  }
 0x14c   : > { %v1522_v43 = vpack.c.bf16 %v834_v63, %v826_v24  ;;  %v1647_v41 = vpop.eup %1646  ;;  %1503 = vmatpush1.bf16.msra.mxu0 %v1502_v56  ;;  %v1512_v16 = vpack.c.bf16 %v833_v36, %v825_v62  ;;  %v714_v38 = vmul.f32 0.5, %v2244_v22  ;;  %v713_v48 = vmul.f32 0.5, %v2248_v39 }
 0x14d   : > { %v835_v61 = vmul.f32 %v803_v42, %v707_v29  ;;  %1511 = vmatpush1.bf16.msra.mxu1 %v1510_v33  ;;  %v808_v40 = vadd.f32 1.0, %v1647_v41  ;;  %v712_v33 = vmul.f32 0.5, %v2233_v23  ;;  %v720_v27 = vmul.f32 0.5, %v2262_v26 }
 0x14e   : > { %v1649_v44 = vpop.eup %1648  ;;  %1513 = vmatprep.subr.bf16.mxu0 %v1512_v16  ;;  %v715_v10 = vmul.f32 0.5, %v2251_v9  ;;  %v722_v24 = vmul.f32 0.5, %v2265_v31  ;;  %v721_v39 = vmul.f32 0.5, %v2269_v60  ;;  %v854_v9 = vld [vmem:[%s2517_s3 + $0x10] sm:$0xff]  ;;  %v723_v50 = vmul.f32 0.5, %v2272_v32 }
 0x14f   : > { %v1520_v45 = vpack.c.bf16 %v835_v61, %v827_v19  ;;  %v1651_v59 = vpop.eup %1650  ;;  %1441 = vmatmul.mubr.msk.f32.vlgmr.msra.gmra.mrb[16].mxu0 %vm323_vm0, %v2297_v55  ;;  %v810_v37 = vadd.f32 1.0, %v1649_v44  ;;  %v840_v0 = vmul.f32 %v808_v40, %v712_v33 }
 0x150   : > { %1445 = vmatmul.mubr.msk.f32.vlgmr.msra.gmra.mrb[16].mxu1 %vm323_vm0, %v2297_v55  ;;  %v1653_v13 = vpop.eup %1652  ;;  %962 = vmatprep.mubr.f32.mxu0 %v2569_v54  ;;  %v809_v53 = vadd.f32 1.0, %v1651_v59 }
 0x151   : > { %1051 = vmatprep.mubr.f32.mxu1 %v2569_v54  ;;  %1521 = vmatprep.subr.bf16.mxu1 %v1520_v45  ;;  %v811_v1 = vadd.f32 1.0, %v1653_v13  ;;  %v842_v26 = vmul.f32 %v810_v37, %v714_v38  ;;  %v2374_v13 = vpop.permute.xlu0 %872 }
 0x152   : > { %v1655_v56 = vpop.eup %1654  ;;  %1515 = vmatpush1.bf16.msra.mxu0 %v1514_v35  ;;  %1523 = vmatpush1.bf16.msra.mxu1 %v1522_v43  ;;  %v841_v34 = vmul.f32 %v809_v53, %v713_v48  ;;  %v2356_v43 = vpop.permute.xlu1 %867 }
 0x153   : > { %v1657_v30 = vpop.eup %1656  ;;  %v816_v51 = vadd.f32 1.0, %v1655_v56  ;;  %1442 = vmatmul.mubr.msk.f32.gmra.mrb[18].mxu0 %vm323_vm0, %v853_v58  ;;  %v843_v62 = vmul.f32 %v811_v1, %v715_v10  ;;  %v2572_v1 = vld [vmem:[#allocation10_spill] sm:$0xff] }
 0x154   : > { %v1659_v29 = vpop.eup %1658  ;;  %v818_v23 = vadd.f32 1.0, %v1657_v30  ;;  %1446 = vmatmul.mubr.msk.f32.gmra.mrb[18].mxu1 %vm323_vm0, %v853_v58  ;;  %968 = vmatprep.mubr.f32.mxu0 %v2569_v54 }
 0x155   : > { %v1661_v22 = vpop.eup %1660  ;;  %v848_v47 = vmul.f32 %v816_v51, %v720_v27  ;;  %v817_v17 = vadd.f32 1.0, %v1659_v29  ;;  %1057 = vmatprep.mubr.f32.mxu1 %v2569_v54  ;;  %v2570_v27 = vld [vmem:[#allocation13_spill] sm:$0xff]  ;;  %v2571_v29 = vld [vmem:[#allocation8_spill] sm:$0xff] }
 0x156   : > { %v850_v31 = vmul.f32 %v818_v23, %v722_v24  ;;  %v819_v52 = vadd.f32 1.0, %v1661_v22 }
 0x157   : > { %v1518_v15 = vpack.c.bf16 %v848_v47, %v840_v0  ;;  %v849_v21 = vmul.f32 %v817_v17, %v721_v39  ;;  %1443 = vmatmul.mubr.msk.f32.gmra.mrb[20].mxu0 %vm323_vm0, %v854_v9 }
 0x158   : > { %v1526_v5 = vpack.c.bf16 %v850_v31, %v842_v26  ;;  %v851_v60 = vmul.f32 %v819_v52, %v723_v50  ;;  %1447 = vmatmul.mubr.msk.f32.gmra.mrb[20].mxu1 %vm323_vm0, %v854_v9  ;;  %974 = vmatprep.mubr.f32.mxu0 %v2569_v54  ;;  %v2573_v26 = vld [vmem:[#allocation12_spill] sm:$0xff]  ;;  %v2574_v50 = vld [vmem:[#allocation14_spill] sm:$0xff] }
 0x159   : > { %1063 = vmatprep.mubr.f32.mxu1 %v2569_v54  ;;  %v1516_v32 = vpack.c.bf16 %v849_v21, %v841_v34  ;;  %v2575_v34 = vld [vmem:[#allocation9_spill] sm:$0xff]  ;;  %v2576_v21 = vld [vmem:[#allocation11_spill] sm:$0xff] }
 0x15a   : > { %v1524_v18 = vpack.c.bf16 %v851_v60, %v843_v62 }
 0x15b   : > { %1517 = vmatprep.subr.bf16.mxu0 %v1516_v32  ;;  %1444 = vmatmul.mubr.msk.f32.gmra.mrb[22].mxu0 %vm323_vm0, %v855_v14 }
 0x15c   : > { %1448 = vmatmul.mubr.msk.f32.gmra.mrb[22].mxu1 %vm323_vm0, %v855_v14  ;;  %1525 = vmatprep.subr.bf16.mxu1 %v1524_v18 }
 0x15d   : > { %1519 = vmatpush1.bf16.msra.mxu0 %v1518_v15  ;;  %1527 = vmatpush1.bf16.msra.mxu1 %v1526_v5 }
 0x15e   : > { %1134 = vmatprep.mubr.f32.mxu0 %v2569_v54  ;;  %1223 = vmatprep.mubr.f32.mxu1 %v2569_v54 }
 0x160   : > { %1449 = vmatmul.mubr.msk.f32.vlgmr.msra.gmra.mrb[24].mxu0 %vm323_vm0, %v2297_v55  ;;  %1453 = vmatmul.mubr.msk.f32.vlgmr.msra.gmra.mrb[24].mxu1 %vm323_vm0, %v2297_v55 }
 0x161   : > { %1140 = vmatprep.mubr.f32.mxu0 %v2569_v54  ;;  %1229 = vmatprep.mubr.f32.mxu1 %v2569_v54 }
 0x164   : > { %1450 = vmatmul.mubr.msk.f32.gmra.mrb[26].mxu0 %vm323_vm0, %v853_v58  ;;  %1454 = vmatmul.mubr.msk.f32.gmra.mrb[26].mxu1 %vm323_vm0, %v853_v58 }
 0x165   : > { %1146 = vmatprep.mubr.f32.mxu0 %v2569_v54  ;;  %1235 = vmatprep.mubr.f32.mxu1 %v2569_v54 }
 0x168   : > { %1451 = vmatmul.mubr.msk.f32.gmra.mrb[28].mxu0 %vm323_vm0, %v854_v9  ;;  %1455 = vmatmul.mubr.msk.f32.gmra.mrb[28].mxu1 %vm323_vm0, %v854_v9 }
 0x169   : > { %1152 = vmatprep.mubr.f32.mxu0 %v2569_v54  ;;  %1241 = vmatprep.mubr.f32.mxu1 %v2569_v54 }
 0x16c   : > { %1452 = vmatmul.mubr.msk.f32.gmra.mrb[30].mxu0 %vm323_vm0, %v855_v14  ;;  %1456 = vmatmul.mubr.msk.f32.gmra.mrb[30].mxu1 %vm323_vm0, %v855_v14 }
 0x222   : > { %v958_v57 = vpop.f32.mrb[16].mxu0 }
 0x223   : > { %v1047_v46 = vpop.f32.mrb[16].mxu1  ;;  %v959_v63 = vadd.f32 %v958_v57, %v2350_v25  ;;  %v960_v28 = vpop.f32.mrb[17].mxu0 }
 0x224   : > { %v1048_v49 = vadd.f32 %v1047_v46, %v2350_v25  ;;  %v1049_v35 = vpop.f32.mrb[17].mxu1  ;;  %v961_v36 = vadd.f32 %v960_v28, %v2350_v25 }
 0x225   : > { %v1050_v42 = vadd.f32 %v1049_v35, %v2350_v25  ;;  %v1248_v41 = vadd.f32 %v959_v63, %v1959_v7  ;;  %v2577_v63 = vld [vmem:[#allocation19_spill] sm:$0xff]  ;;  %v2578_v35 = vld [vmem:[#allocation21_spill] sm:$0xff] }
 0x226   : > { %v1250_v19 = vadd.f32 %v1048_v49, %v1969_v11  ;;  %v1249_v61 = vadd.f32 %v961_v36, %v1945_v2  ;;  %v964_v16 = vpop.f32.mrb[18].mxu0 }
 0x227   : > { %v1251_v55 = vadd.f32 %v1050_v42, %v1951_v4  ;;  %v1053_v44 = vpop.f32.mrb[18].mxu1  ;;  %1280 = vst [vmem:[%s2364_s15] sm:$0xff] %v1248_v41  ;;  %v965_v7 = vadd.f32 %v964_v16, %v2356_v43  ;;  %v966_v2 = vpop.f32.mrb[19].mxu0  ;;  %v2579_v42 = vld [vmem:[#allocation15_spill] sm:$0xff] }
 0x228   : > { %1282 = vst [vmem:[%s2364_s15 + $0x10] sm:$0xff] %v1250_v19  ;;  %v1054_v11 = vadd.f32 %v1053_v44, %v2356_v43  ;;  %v1055_v45 = vpop.f32.mrb[19].mxu1  ;;  %1281 = vst [vmem:[%s2364_s15 + $0x8] sm:$0xff] %v1249_v61  ;;  %v967_v4 = vadd.f32 %v966_v2, %v2356_v43  ;;  %v2580_v61 = vld [vmem:[#allocation17_spill] sm:$0xff] }
 0x229   : > { %1283 = vst [vmem:[%s2364_s15 + $0x18] sm:$0xff] %v1251_v55  ;;  %v1056_v59 = vadd.f32 %v1055_v45, %v2356_v43  ;;  %v1256_v40 = vadd.f32 %v965_v7, %v1962_v8  ;;  %v2581_v45 = vld [vmem:[#allocation20_spill] sm:$0xff] }
 0x22a   : > { %v1258_v54 = vadd.f32 %v1054_v11, %v1972_v12  ;;  %v1257_v58 = vadd.f32 %v967_v4, %v1948_v3  ;;  %v970_v33 = vpop.f32.mrb[20].mxu0 }
 0x22b   : > { %v1259_v56 = vadd.f32 %v1056_v59, %v1956_v6  ;;  %v1059_v38 = vpop.f32.mrb[20].mxu1  ;;  %1288 = vst [vmem:[%s2364_s15 + $0x40] sm:$0xff] %v1256_v40  ;;  %v971_v37 = vadd.f32 %v970_v33, %v2374_v13  ;;  %v972_v48 = vpop.f32.mrb[21].mxu0  ;;  %v2582_v40 = vld [vmem:[#allocation22_spill] sm:$0xff] }
 0x22c   : > { %1290 = vst [vmem:[%s2364_s15 + $0x50] sm:$0xff] %v1258_v54  ;;  %v1060_v30 = vadd.f32 %v1059_v38, %v2374_v13  ;;  %v1061_v53 = vpop.f32.mrb[21].mxu1  ;;  %1289 = vst [vmem:[%s2364_s15 + $0x48] sm:$0xff] %v1257_v58  ;;  %v973_v8 = vadd.f32 %v972_v48, %v2374_v13  ;;  %v2388_v6 = vpop.permute.xlu1 %877  ;;  %v2583_v58 = vld [vmem:[#allocation16_spill] sm:$0xff]  ;;  %v2584_v38 = vld [vmem:[#allocation18_spill] sm:$0xff] }
 0x22d   : > { %1291 = vst [vmem:[%s2364_s15 + $0x58] sm:$0xff] %v1259_v56  ;;  %v1062_v3 = vadd.f32 %v1061_v53, %v2374_v13  ;;  %v1264_v12 = vadd.f32 %v971_v37, %v1993_v20 }
 0x22e   : > { %v1266_v51 = vadd.f32 %v1060_v30, %v2570_v27  ;;  %v1265_v10 = vadd.f32 %v973_v8, %v2571_v29  ;;  %v976_v23 = vpop.f32.mrb[22].mxu0  ;;  %v2586_v29 = vld [vmem:[#allocation26_spill] sm:$0xff] }
 0x22f   : > { %v1267_v24 = vadd.f32 %v1062_v3, %v2572_v1  ;;  %v1065_v22 = vpop.f32.mrb[22].mxu1  ;;  %1296 = vst [vmem:[%s2364_s15 + $0x80] sm:$0xff] %v1264_v12  ;;  %v977_v0 = vadd.f32 %v976_v23, %v2388_v6  ;;  %v978_v39 = vpop.f32.mrb[23].mxu0  ;;  %v2585_v12 = vld [vmem:[#allocation25_spill] sm:$0xff]  ;;  %v2587_v1 = vld [vmem:[#allocation23_spill] sm:$0xff] }
 0x230   : > { %1298 = vst [vmem:[%s2364_s15 + $0x90] sm:$0xff] %v1266_v51  ;;  %v1066_v47 = vadd.f32 %v1065_v22, %v2388_v6  ;;  %v1067_v17 = vpop.f32.mrb[23].mxu1  ;;  %1297 = vst [vmem:[%s2364_s15 + $0x88] sm:$0xff] %v1265_v10  ;;  %v979_v20 = vadd.f32 %v978_v39, %v2388_v6  ;;  %v2588_v22 = vld [vmem:[#allocation24_spill] sm:$0xff] }
 0x231   : > { %1299 = vst [vmem:[%s2364_s15 + $0x98] sm:$0xff] %v1267_v24  ;;  %v1068_v9 = vadd.f32 %v1067_v17, %v2388_v6  ;;  %v1272_v31 = vadd.f32 %v977_v0, %v2573_v26  ;;  %v1662_v26 = vld [vmem:[%s1936_s11 + $0xe0] sm:$0xff] }
 0x232   : > { %v1274_v52 = vadd.f32 %v1066_v47, %v2574_v50  ;;  %v1273_v15 = vadd.f32 %v979_v20, %v2575_v34 }
 0x233   : > { %v1275_v62 = vadd.f32 %v1068_v9, %v2576_v21  ;;  %v1136_v5 = vpop.f32.mrb[24].mxu0  ;;  %1304 = vst [vmem:[%s2364_s15 + $0xc0] sm:$0xff] %v1272_v31  ;;  %v1225_v14 = vpop.f32.mrb[24].mxu1 }
 0x234   : > { %1306 = vst [vmem:[%s2364_s15 + $0xd0] sm:$0xff] %v1274_v52  ;;  %v1137_v60 = vadd.f32 %v1136_v5, %v2350_v25  ;;  %v1138_v32 = vpop.f32.mrb[25].mxu0  ;;  %1305 = vst [vmem:[%s2364_s15 + $0xc8] sm:$0xff] %v1273_v15  ;;  %v1226_v18 = vadd.f32 %v1225_v14, %v2350_v25  ;;  %v1227_v46 = vpop.f32.mrb[25].mxu1  ;;  %v1663_v52 = vld [vmem:[%s1936_s11 + $0xf0] sm:$0xff]  ;;  %v1664_v15 = vld [vmem:[%s1936_s11 + $0xe8] sm:$0xff] }
 0x235   : > { %1307 = vst [vmem:[%s2364_s15 + $0xd8] sm:$0xff] %v1275_v62  ;;  %v1139_v57 = vadd.f32 %v1138_v32, %v2350_v25  ;;  %v1228_v28 = vadd.f32 %v1227_v46, %v2350_v25  ;;  %v1665_v62 = vld [vmem:[%s1936_s11 + $0xf8] sm:$0xff] }
 0x236   : > { %v1252_v49 = vadd.f32 %v1137_v60, %v2577_v63  ;;  %v1254_v36 = vadd.f32 %v1226_v18, %v2578_v35 }
 0x237   : > { %v1253_v41 = vadd.f32 %v1139_v57, %v2579_v42  ;;  %v1142_v19 = vpop.f32.mrb[26].mxu0  ;;  %v1255_v55 = vadd.f32 %v1228_v28, %v2580_v61  ;;  %v1231_v44 = vpop.f32.mrb[26].mxu1 }
 0x238   : > { %1284 = vst [vmem:[%s2364_s15 + $0x20] sm:$0xff] %v1252_v49  ;;  %v1143_v16 = vadd.f32 %v1142_v19, %v2356_v43  ;;  %v1144_v7 = vpop.f32.mrb[27].mxu0  ;;  %1286 = vst [vmem:[%s2364_s15 + $0x30] sm:$0xff] %v1254_v36  ;;  %v1232_v11 = vadd.f32 %v1231_v44, %v2356_v43  ;;  %v1233_v2 = vpop.f32.mrb[27].mxu1 }
 0x239   : > { %1285 = vst [vmem:[%s2364_s15 + $0x28] sm:$0xff] %v1253_v41  ;;  %v1145_v25 = vadd.f32 %v1144_v7, %v2356_v43  ;;  %1287 = vst [vmem:[%s2364_s15 + $0x38] sm:$0xff] %v1255_v55  ;;  %v1234_v59 = vadd.f32 %v1233_v2, %v2356_v43 }
 0x23a   : > { %v1260_v4 = vadd.f32 %v1143_v16, %v2581_v45  ;;  %v1262_v54 = vadd.f32 %v1232_v11, %v2582_v40 }
 0x23b   : > { %v1261_v56 = vadd.f32 %v1145_v25, %v2583_v58  ;;  %v1148_v33 = vpop.f32.mrb[28].mxu0  ;;  %v1263_v37 = vadd.f32 %v1234_v59, %v2584_v38  ;;  %v1237_v48 = vpop.f32.mrb[28].mxu1 }
 0x23c   : > { %1292 = vst [vmem:[%s2364_s15 + $0x60] sm:$0xff] %v1260_v4  ;;  %v1149_v30 = vadd.f32 %v1148_v33, %v2374_v13  ;;  %v1150_v53 = vpop.f32.mrb[29].mxu0  ;;  %1294 = vst [vmem:[%s2364_s15 + $0x70] sm:$0xff] %v1262_v54  ;;  %v1238_v8 = vadd.f32 %v1237_v48, %v2374_v13  ;;  %v1239_v3 = vpop.f32.mrb[29].mxu1 }
 0x23d   : > { %1293 = vst [vmem:[%s2364_s15 + $0x68] sm:$0xff] %v1261_v56  ;;  %v1151_v43 = vadd.f32 %v1150_v53, %v2374_v13  ;;  %1295 = vst [vmem:[%s2364_s15 + $0x78] sm:$0xff] %v1263_v37  ;;  %v1240_v51 = vadd.f32 %v1239_v3, %v2374_v13 }
 0x23e   : > { %v1268_v27 = vadd.f32 %v1149_v30, %v2585_v12  ;;  %v1270_v10 = vadd.f32 %v1238_v8, %v2586_v29 }
 0x23f   : > { %v1269_v24 = vadd.f32 %v1151_v43, %v2587_v1  ;;  %v1154_v23 = vpop.f32.mrb[30].mxu0  ;;  %v1271_v0 = vadd.f32 %v1240_v51, %v2588_v22  ;;  %v1243_v39 = vpop.f32.mrb[30].mxu1 }
 0x240   : > { %1300 = vst [vmem:[%s2364_s15 + $0xa0] sm:$0xff] %v1268_v27  ;;  %v1155_v47 = vadd.f32 %v1154_v23, %v2388_v6  ;;  %v1156_v17 = vpop.f32.mrb[31].mxu0  ;;  %1302 = vst [vmem:[%s2364_s15 + $0xb0] sm:$0xff] %v1270_v10  ;;  %v1244_v13 = vadd.f32 %v1243_v39, %v2388_v6  ;;  %v1245_v9 = vpop.f32.mrb[31].mxu1 }
 0x241   : > { %1301 = vst [vmem:[%s2364_s15 + $0xa8] sm:$0xff] %v1269_v24  ;;  %v1157_v20 = vadd.f32 %v1156_v17, %v2388_v6  ;;  %1303 = vst [vmem:[%s2364_s15 + $0xb8] sm:$0xff] %v1271_v0  ;;  %v1246_v50 = vadd.f32 %v1245_v9, %v2388_v6 }
 0x242   : > { %v1276_v31 = vadd.f32 %v1662_v26, %v1155_v47  ;;  %v1278_v34 = vadd.f32 %v1663_v52, %v1244_v13 }
 0x243   : > { %v1277_v21 = vadd.f32 %v1664_v15, %v1157_v20  ;;  %v1279_v5 = vadd.f32 %v1665_v62, %v1246_v50 }
 0x244   : > { %1308 = vst [vmem:[%s2364_s15 + $0xe0] sm:$0xff] %v1276_v31  ;;  %1310 = vst [vmem:[%s2364_s15 + $0xf0] sm:$0xff] %v1278_v34 }
 0x245   : > { %1309 = vst [vmem:[%s2364_s15 + $0xe8] sm:$0xff] %v1277_v21  ;;  %1311 = vst [vmem:[%s2364_s15 + $0xf8] sm:$0xff] %v1279_v5 }
 0x246   : > { %1709 = shalt.err (!%p1706_p5)
}
 0x247   : > { %s1710_s11 = scalar_lea.hbm %s2458_s10, 4096  ;;  %s1714_s13 = scalar_lea.hbm %s2519_s5, 8192 }
 0x248   : > { %p1711_p4 = scmp.ne.s32.totalorder %s2458_s10, %s1710_s11  ;;  %p1715_p12 = scmp.lt.u32.totalorder %s2458_s10, %s2519_s5 }
 0x249   : > { %p1716_p1 = scmp.lt.u32.totalorder %s1714_s13, %s1710_s11  ;;  %p1718_p8 = scmp.lt.u32.totalorder %s1710_s11, %s2458_s10 }
 0x24a   : > { %p1712_p7 = pnand %p1711_p4, %p2589_p9 }
 0x24b   : > { %p1717_p3 = por %p1716_p1, %p1715_p12 }
 0x24c   : > { %p1713_p10 = pneg %p1712_p7 }
 0x24d   : > { %p1719_p11 = por %p1718_p8, %p1717_p3 }
 0x24f   : > { %p1720_p0 = pnand %p1719_p11, %p1713_p10 }
 0x251   : > { %1723 = shalt.err (!%p1720_p0)
}
 0x252   : > { %s1786_s21 = smov 1024   ;;  %s1787_s27 = smov 64  }
 0x253   : > { %1530 = dma.vmem_to_hbm [thread:$0]  (%p2589_p9), %s2460_s25, 4096, %s2458_s10, %s1313_s30, %s1786_s21, %s1786_s21, %s1787_s27  }
 0x254 PF: > { %s1343_s14 = sand.u32 1, %s1758_s18   ;;  %p2590_p6 = scmp.ne.s32.totalorder %s2545_s8, 0 }
 0x255   : > { %p2591_p13 = scmp.ge.s32.totalorder %s1778_s23, 2  ;;  %s1344_s16 = scalar_lea.sflag [#allocation4], %s1343_s14 }
 0x257   : > { %p1537_p2 = pnand %p2591_p13, %p2590_p6 }
 0x259   : > { %1753 = dma.done.wait (!%p1537_p2), %s1344_s16, 4096  }
 0x25a   : > { %1755 = vsyncadd (!%p1537_p2), %s1344_s16, 4294963200  ;;  %s21_s23 = sadd.s32 1, %s1778_s23   ;;  %s2592_s18 = smov %s1762_s19 }
 0x25b   : > { %p18_p5 = scmp.ge.s32.totalorder %s21_s23, 4   ;;  %s2593_s19 = smov %s1766_s20 }
 0x25c   : > { %s2594_s20 = smov %s1874_s7  ;;  %s2595_s21 = smov %s1774_s22 }
 0x25d   : > { %s2596_s22 = smov %s2598_s26  ;;  %20 = sbr.rel (!%p18_p5) target bundleno = 6 (0x6), region = 85 }
 0x264   :  { %1349 = vsyncpa [#allocation3], 1 }
 0x265   :  { %1351 = vsyncpa [#allocation3 + $0x1], 1 }
 0x266   :  { %1352 = vsyncpa [#allocation4], 1 }
 0x267   :  { %1354 = vsyncpa [#allocation4 + $0x1], 1 }

</bundles_post_ra>
